<compile_context>
chip_gen: v5e
topology: v5e:2x2
jax: 0.10.0
libtpu: 0.0.40
codegen_flags: <defaults>
</compile_context>

<pallas_src>
import jax
import jax.numpy as jnp
from jax import lax
from jax.experimental import pallas as pl
from jax.experimental.pallas import tpu as pltpu

_MIB = 1024 * 1024


def _round_up(x, m):
    return (x + m - 1) // m * m


def _pick_divisor_tile(total, candidates):
    for c in candidates:
        if total % c == 0:
            return c
    return total


# ----------------------------------------------------------------------------
# Kernel 1: fused per-node-type Linear (grouped matmul, one pallas_call,
#           K-tiled with a VMEM f32 accumulator)
# ----------------------------------------------------------------------------
def _fused_linear_kernel(tile_type_ref, x_ref, w_ref, b_ref, o_ref, acc_ref):
    # tile_type_ref is the scalar-prefetch ref (consumed only by the index_maps).
    del tile_type_ref
    k = pl.program_id(1)

    @pl.when(k == 0)
    def _():
        acc_ref[...] = jnp.zeros_like(acc_ref)

    # x_ref: (tile_n, tile_k) bf16, w_ref: (1, tile_k, e_pad) bf16 -> f32 acc.
    acc_ref[...] += jnp.dot(x_ref[...], w_ref[0],
                            preferred_element_type=jnp.float32)

    @pl.when(k == pl.num_programs(1) - 1)
    def _():
        o_ref[...] = (acc_ref[...] + b_ref[0]).astype(o_ref.dtype)


def pack_linear_params(linear_params, types, dim_emb):
    """Pad + stack the per-type Linear weights ONCE (init time, not per step)."""
    k_pad = _round_up(max(linear_params[nt]["w"].shape[0] for nt in types), 128)
    e_pad = _round_up(dim_emb, 128)
    w_all = jnp.stack([
        jnp.pad(linear_params[nt]["w"],
                ((0, k_pad - linear_params[nt]["w"].shape[0]),
                 (0, e_pad - linear_params[nt]["w"].shape[1])))
        for nt in types
    ]).astype(jnp.bfloat16)                                   # (T, k_pad, e_pad)
    b_all = jnp.stack([
        jnp.pad(linear_params[nt]["b"],
                (0, e_pad - linear_params[nt]["b"].shape[0]))
        for nt in types
    ]).astype(jnp.float32)[:, None, :]                        # (T, 1, e_pad)
    return {"types": tuple(types), "w_all": w_all, "b_all": b_all,
            "k_pad": k_pad, "e_pad": e_pad, "dim_emb": dim_emb}


def fused_hetero_linear(xs, packed, *, tile_n=None):
    """One pallas_call computing y_t = x_t @ W_t + b_t for every node type t."""
    types = [nt for nt in packed["types"] if nt in xs]
    assert set(types) == set(xs.keys())
    k_pad, e_pad = packed["k_pad"], packed["e_pad"]
    dim_emb = packed["dim_emb"]
    w_all, b_all = packed["w_all"], packed["b_all"]

    ns = [xs[nt].shape[0] for nt in types]
    if tile_n is None:
        max_n = max(ns)
        if max_n >= 1024:
            tile_n = 512                       # MXU-aligned large tiles
        elif max_n >= 256:
            tile_n = 256
        else:
            tile_n = max(16, _round_up(max_n, 16))
        # v7x has 2 TensorCores: make sure the "parallel" axis has >= 2 tiles.
        if sum(_round_up(n, tile_n) // tile_n for n in ns) < 2 and tile_n >= 32:
            tile_n = max(16, _round_up(tile_n // 2, 16))

    # K tiling keeps double-buffered W blocks small for large dim_in.
    tile_k = k_pad if k_pad <= 1024 else _pick_divisor_tile(k_pad, (512, 256, 128))
    num_k = k_pad // tile_k

    # Activation path: one pad per type + one concatenate (no zeros+scatter).
    x_blocks, tile_type, offsets = [], [], []
    off = 0
    for t, nt in enumerate(types):
        x = xs[nt].astype(jnp.bfloat16)
        n, k = x.shape
        n_pad = _round_up(n, tile_n)
        x_blocks.append(jnp.pad(x, ((0, n_pad - n), (0, k_pad - k))))
        tile_type += [t] * (n_pad // tile_n)
        offsets.append(off)
        off += n_pad
    x_all = jnp.concatenate(x_blocks, axis=0)          # (n_total, k_pad) bf16
    n_total = off
    num_tiles = len(tile_type)
    tile_type = jnp.asarray(tile_type, jnp.int32)      # scalar-prefetch array

    cost = pl.CostEstimate(
        flops=2 * n_total * k_pad * e_pad,
        transcendentals=0,
        bytes_accessed=(n_total * k_pad * 2               # x (bf16)
                        + num_tiles * k_pad * e_pad * 2   # W blocks (bf16)
                        + num_tiles * e_pad * 4           # biases
                        + n_total * e_pad * 4),           # y (f32)
    )
    vmem_need = (2 * (tile_n * tile_k * 2 + tile_k * e_pad * 2 + e_pad * 4
                      + tile_n * e_pad * 4)
                 + tile_n * e_pad * 4)
    vmem_limit = int(min(max(2 * vmem_need, 32 * _MIB), 64 * _MIB))

    y = pl.pallas_call(
        _fused_linear_kernel,
        out_shape=jax.ShapeDtypeStruct((n_total, e_pad), jnp.float32),
        grid_spec=pltpu.PrefetchScalarGridSpec(
            num_scalar_prefetch=1,
            grid=(num_tiles, num_k),
            in_specs=[
                pl.BlockSpec((tile_n, tile_k), lambda i, k, tt: (i, k)),        # x
                pl.BlockSpec((1, tile_k, e_pad), lambda i, k, tt: (tt[i], k, 0)),  # W_t
                pl.BlockSpec((1, 1, e_pad), lambda i, k, tt: (tt[i], 0, 0)),       # b_t
            ],
            out_specs=pl.BlockSpec((tile_n, e_pad), lambda i, k, tt: (i, 0)),
            scratch_shapes=[pltpu.VMEM((tile_n, e_pad), jnp.float32)],
        ),
        compiler_params=pltpu.CompilerParams(
            dimension_semantics=("parallel", "arbitrary"),
            vmem_limit_bytes=vmem_limit,
        ),
        cost_estimate=cost,
    )(tile_type, x_all, w_all, b_all)

    out = {}
    for t, nt in enumerate(types):
        n = xs[nt].shape[0]
        out[nt] = y[offsets[t]: offsets[t] + n, :dim_emb]
    return out


# ----------------------------------------------------------------------------
# Kernel 2: batched embedding gather (row-tiled one-hot @ table on the MXU)
# ----------------------------------------------------------------------------
def _gather_kernel(ids_ref, table_ref, o_ref, acc_ref):
    # ids_ref: (tile_m, 1) int32, table_ref: (tile_r, e_pad), o_ref: (tile_m, e_pad)
    r = pl.program_id(1)
    tile_r = table_ref.shape[0]

    @pl.when(r == 0)
    def _():
        acc_ref[...] = jnp.zeros_like(acc_ref)

    ids = ids_ref[...]
    col = r * tile_r + lax.broadcasted_iota(jnp.int32, (ids.shape[0], tile_r), 1)
    onehot = (col == ids).astype(table_ref.dtype)          # (tile_m, tile_r)
    acc_ref[...] += jnp.dot(onehot, table_ref[...],
                            preferred_element_type=jnp.float32)

    @pl.when(r == pl.num_programs(1) - 1)
    def _():
        o_ref[...] = acc_ref[...].astype(o_ref.dtype)


def embedding_gather(table, n_id, *, tile_m=None, tile_r=None):
    """out[i] = table[n_id[i]]  (mini-batch sampler path of the encoder).

    The table is streamed in (tile_r, e_pad) row tiles over an inner
    "arbitrary" grid axis with an f32 accumulator, so the whole table never
    has to be VMEM-resident (scalable on v7x's 64 MiB VMEM).
    """
    # TODO(synk): out-of-range n_id values silently produce zero rows (one-hot
    # has no matching column) whereas torch.nn.Embedding raises.
    m = n_id.shape[0]
    num_rows, dim_emb = table.shape
    e_pad = _round_up(dim_emb, 128)
    r_pad = _round_up(num_rows, 128)          # lane/K dim of the in-kernel one-hot
    if tile_m is None:
        tile_m = min(256, max(8, _round_up(m, 8)))
    if tile_r is None:
        tile_r = r_pad if r_pad <= 2048 else _pick_divisor_tile(r_pad, (512, 256, 128))
    m_pad = _round_up(m, tile_m)

    tab = jnp.pad(table, ((0, r_pad - num_rows), (0, e_pad - dim_emb)))
    ids = jnp.pad(n_id.astype(jnp.int32), (0, m_pad - m)).reshape(m_pad, 1)

    num_m = m_pad // tile_m
    num_r = r_pad // tile_r

    cost = pl.CostEstimate(
        flops=2 * m_pad * r_pad * e_pad,
        transcendentals=0,
        bytes_accessed=(m_pad * 4 + num_m * r_pad * e_pad * 4 + m_pad * e_pad * 4),
    )
    vmem_need = (2 * (tile_m * 4 + tile_r * e_pad * 4 + tile_m * e_pad * 4)
                 + tile_m * e_pad * 4)
    vmem_limit = int(min(max(2 * vmem_need, 32 * _MIB), 64 * _MIB))

    out = pl.pallas_call(
        _gather_kernel,
        out_shape=jax.ShapeDtypeStruct((m_pad, e_pad), table.dtype),
        grid=(num_m, num_r),
        in_specs=[
            pl.BlockSpec((tile_m, 1), lambda i, r: (i, 0)),       # id tile
            pl.BlockSpec((tile_r, e_pad), lambda i, r: (r, 0)),   # table row tile
        ],
        out_specs=pl.BlockSpec((tile_m, e_pad), lambda i, r: (i, 0)),
        scratch_shapes=[pltpu.VMEM((tile_m, e_pad), jnp.float32)],
        compiler_params=pltpu.CompilerParams(
            dimension_semantics=("parallel", "arbitrary"),
            vmem_limit_bytes=vmem_limit,
        ),
        cost_estimate=cost,
    )(ids, tab)
    return out[:m, :dim_emb]


# ----------------------------------------------------------------------------
# Module-level glue (mirrors HeteroRawNodeEncoder.__init__ / forward)
# ----------------------------------------------------------------------------
def init_params(key, dim_in, dim_emb, num_nodes_no_x):
    """Deterministic synthetic parameters (shapes from the module __init__)."""
    params = {"linear": {}, "encoder": {}}
    for nt, d in dim_in.items():  # nn.Linear(dim_in[nt], dim_emb) per type
        key, kw, kb = jax.random.split(key, 3)
        bound = 1.0 / jnp.sqrt(jnp.float32(d))
        params["linear"][nt] = {
            "w": jax.random.uniform(kw, (d, dim_emb), jnp.float32, -bound, bound),
            "b": jax.random.uniform(kb, (dim_emb,), jnp.float32, -bound, bound),
        }
    for nt, n in num_nodes_no_x.items():  # nn.Embedding(num_nodes, dim_emb)
        key, ke = jax.random.split(key)
        params["encoder"][nt] = jax.random.normal(ke, (n, dim_emb), jnp.float32)
    return params


def hetero_raw_node_encoder(batch, params, packed_linear, *, sampler="neighbor"):
    """Forward pass on a dict-of-node-types batch.

    batch[node_type] holds either 'x' (featured types) or 'n_id' / 'num_nodes'
    (featureless types), mirroring a HeteroData store.  Returns the new
    per-type 'x' embeddings (the module writes them in place).
    """
    out = {}

    # Featured node types: one fused grouped-linear pallas_call for all types.
    featured = {nt: store["x"] for nt, store in batch.items() if "x" in store}
    if featured:
        out.update(fused_hetero_linear(featured, packed_linear))

    # Featureless node types: full table passthrough or batched gather.
    for nt, store in batch.items():
        if "x" in store:
            continue
        if sampler == "full_batch":
            # self.encoder[node_type].weight.data — plain parameter passthrough.
            out[nt] = params["encoder"][nt]
        else:
            out[nt] = embedding_gather(params["encoder"][nt], store["n_id"])
    return out


# ----------------------------------------------------------------------------
if __name__ == "__main__":
    key = jax.random.PRNGKey(0)

    # Synthetic heterogeneous graph:
    #   'paper'  : 64 nodes with 24-dim raw features   -> Linear(24, 96)
    #   'author' : 40 nodes with 12-dim raw features   -> Linear(12, 96)
    #   'venue'  : 56 nodes WITHOUT features           -> Embedding(56, 96)
    dim_emb = 96
    dim_in = {"paper": 24, "author": 12}
    num_nodes_no_x = {"venue": 56}

    key, kp, ka, ki = jax.random.split(key, 4)
    x_paper = jax.random.normal(kp, (64, dim_in["paper"]), jnp.float32)
    x_author = jax.random.normal(ka, (40, dim_in["author"]), jnp.float32)
    n_id_venue = jax.random.randint(ki, (16,), 0, num_nodes_no_x["venue"], jnp.int32)

    batch = {
        "paper": {"x": x_paper},
        "author": {"x": x_author},
        "venue": {"n_id": n_id_venue, "num_nodes": num_nodes_no_x["venue"]},
    }

    params = init_params(jax.random.PRNGKey(1), dim_in, dim_emb, num_nodes_no_x)
    # Hoisted out of the forward: pack/pad the Linear params once at init.
    packed_linear = pack_linear_params(params["linear"], list(dim_in.keys()), dim_emb)

    # Mini-batch sampler path (batched gather kernel for 'venue').
    out = hetero_raw_node_encoder(batch, params, packed_linear, sampler="neighbor")
    out = jax.block_until_ready(out)

    # Full-batch sampler path (returns the whole embedding table for 'venue').
    out_full = hetero_raw_node_encoder(batch, params, packed_linear, sampler="full_batch")
    out_full = jax.block_until_ready(out_full)

    # References in plain JAX.  The kernel feeds bf16 x/W to the MXU with f32
    # accumulation, so the tight reference casts inputs to bf16 first; a loose
    # check against the pure-f32 reference guards the semantics.
    def ref_linear_bf16(x, w, b):
        return (x.astype(jnp.bfloat16).astype(jnp.float32)
                @ w.astype(jnp.bfloat16).astype(jnp.float32) + b)

    ref_paper_bf = ref_linear_bf16(x_paper, params["linear"]["paper"]["w"],
                                   params["linear"]["paper"]["b"])
    ref_author_bf = ref_linear_bf16(x_author, params["linear"]["author"]["w"],
                                    params["linear"]["author"]["b"])
    ref_paper_f32 = x_paper @ params["linear"]["paper"]["w"] + params["linear"]["paper"]["b"]
    ref_author_f32 = x_author @ params["linear"]["author"]["w"] + params["linear"]["author"]["b"]
    ref_venue = params["encoder"]["venue"][n_id_venue]

    assert out["paper"].shape == (64, dim_emb)
    assert out["author"].shape == (40, dim_emb)
    assert out["venue"].shape == (16, dim_emb)
    assert out_full["venue"].shape == (num_nodes_no_x["venue"], dim_emb)
    assert jnp.allclose(out["paper"], ref_paper_bf, atol=1e-3, rtol=1e-3)
    assert jnp.allclose(out["author"], ref_author_bf, atol=1e-3, rtol=1e-3)
    assert jnp.allclose(out["paper"], ref_paper_f32, atol=5e-2, rtol=5e-2)
    assert jnp.allclose(out["author"], ref_author_f32, atol=5e-2, rtol=5e-2)
    assert jnp.allclose(out["venue"], ref_venue, atol=1e-5)
    assert jnp.allclose(out_full["venue"], params["encoder"]["venue"], atol=1e-6)

    print("KERNEL_OK")
</pallas_src>

<mosaic_0001>
module attributes {stable_mosaic.version = 11 : i64} {
  func.func @_fused_linear_kernel(%arg0: i32, %arg1: i32, %arg2: memref<2xi32, #tpu.memory_space<smem>>, %arg3: memref<64x128xbf16, #tpu.memory_space<vmem>>, %arg4: memref<1x128x128xbf16, #tpu.memory_space<vmem>>, %arg5: memref<1x1x128xf32, #tpu.memory_space<vmem>>, %arg6: memref<64x128xf32, #tpu.memory_space<vmem>>, %arg7: memref<64x128xf32, #tpu.memory_space<vmem>>) attributes {dimension_semantics = [#tpu.dimension_semantics<parallel>, #tpu.dimension_semantics<arbitrary>], iteration_bounds = array<i64: 2, 1>, scalar_prefetch = 1 : i64, scratch_operands = 1 : i64, tpu.core_type = #tpu.core_type<tc>, window_params = [{transform_indices = @transform_0, window_bounds = array<i64: 64, 128>}, {transform_indices = @transform_1, window_bounds = array<i64: 1, 128, 128>}, {transform_indices = @transform_2, window_bounds = array<i64: 1, 1, 128>}, {transform_indices = @transform_3, window_bounds = array<i64: 64, 128>}]} {
    %c0_i32 = arith.constant 0 : i32
    %0 = arith.cmpi eq, %arg1, %c0_i32 : i32
    %1 = arith.extui %0 : i1 to i32
    %c0_i32_0 = arith.constant 0 : i32
    %2 = arith.cmpi ne, %1, %c0_i32_0 : i32
    scf.if %2 {
      %cst_11 = arith.constant 0.000000e+00 : f32
      %13 = vector.broadcast %cst_11 : f32 to vector<64x128xf32>
      %c0_12 = arith.constant 0 : index
      %c0_13 = arith.constant 0 : index
      %14 = vector.load %arg7[%c0_12, %c0_13] : memref<64x128xf32, #tpu.memory_space<vmem>>, vector<64x128xf32>
      tpu.vector_store %arg7[%c0_12, %c0_13], %13 {strides = array<i32>} : memref<64x128xf32, #tpu.memory_space<vmem>>, vector<64x128xf32>,
    } else {
    }
    %c0 = arith.constant 0 : index
    %c0_1 = arith.constant 0 : index
    %3 = vector.load %arg7[%c0, %c0_1] : memref<64x128xf32, #tpu.memory_space<vmem>>, vector<64x128xf32>
    %c0_2 = arith.constant 0 : index
    %c0_3 = arith.constant 0 : index
    %4 = vector.load %arg3[%c0_2, %c0_3] : memref<64x128xbf16, #tpu.memory_space<vmem>>, vector<64x128xbf16>
    %c0_4 = arith.constant 0 : index
    %c0_5 = arith.constant 0 : index
    %c0_6 = arith.constant 0 : index
    %5 = vector.load %arg4[%c0_4, %c0_5, %c0_6] : memref<1x128x128xbf16, #tpu.memory_space<vmem>>, vector<1x128x128xbf16>
    %6 = vector.shape_cast %5 : vector<1x128x128xbf16> to vector<128x128xbf16>
    %cst = arith.constant dense<0.000000e+00> : vector<64x128xf32>
    %7 = tpu.matmul %4, %6, %cst {dimension_numbers = #tpu.dot_dimension_numbers<[1], [0], [0], [1], [0, 0, 1, 1], [], []>} : vector<64x128xbf16>, vector<128x128xbf16>, vector<64x128xf32> -> vector<64x128xf32>
    %8 = arith.addf %3, %7 : vector<64x128xf32>
    %c0_7 = arith.constant 0 : index
    %c0_8 = arith.constant 0 : index
    %9 = vector.load %arg7[%c0_7, %c0_8] : memref<64x128xf32, #tpu.memory_space<vmem>>, vector<64x128xf32>
    tpu.vector_store %arg7[%c0_7, %c0_8], %8 {strides = array<i32>} : memref<64x128xf32, #tpu.memory_space<vmem>>, vector<64x128xf32>,
    %c0_i32_9 = arith.constant 0 : i32
    %10 = arith.cmpi eq, %arg1, %c0_i32_9 : i32
    %11 = arith.extui %10 : i1 to i32
    %c0_i32_10 = arith.constant 0 : i32
    %12 = arith.cmpi ne, %11, %c0_i32_10 : i32
    scf.if %12 {
      %c0_11 = arith.constant 0 : index
      %c0_12 = arith.constant 0 : index
      %13 = vector.load %arg7[%c0_11, %c0_12] : memref<64x128xf32, #tpu.memory_space<vmem>>, vector<64x128xf32>
      %c0_13 = arith.constant 0 : index
      %c0_14 = arith.constant 0 : index
      %c0_15 = arith.constant 0 : index
      %14 = vector.load %arg5[%c0_13, %c0_14, %c0_15] : memref<1x1x128xf32, #tpu.memory_space<vmem>>, vector<1x1x128xf32>
      %15 = vector.shape_cast %14 : vector<1x1x128xf32> to vector<1x128xf32>
      %16 = vector.broadcast %15 : vector<1x128xf32> to vector<64x128xf32>
      %17 = arith.addf %13, %16 : vector<64x128xf32>
      %c0_16 = arith.constant 0 : index
      %c0_17 = arith.constant 0 : index
      %18 = vector.load %arg6[%c0_16, %c0_17] : memref<64x128xf32, #tpu.memory_space<vmem>>, vector<64x128xf32>
      tpu.vector_store %arg6[%c0_16, %c0_17], %17 {strides = array<i32>} : memref<64x128xf32, #tpu.memory_space<vmem>>, vector<64x128xf32>,
    } else {
    }
    return
  }
  func.func @transform_0(%arg0: i32, %arg1: i32, %arg2: memref<2xi32, #tpu.memory_space<smem>>) -> (i32, i32) {
    %c0_i32 = arith.constant 0 : i32
    return %arg0, %arg1 : i32, i32
  }
  func.func @transform_1(%arg0: i32, %arg1: i32, %arg2: memref<2xi32, #tpu.memory_space<smem>>) -> (i32, i32, i32) {
    %0 = arith.index_cast %arg0 : i32 to index
    %1 = memref.load %arg2[%0] : memref<2xi32, #tpu.memory_space<smem>>
    %c0_i32 = arith.constant 0 : i32
    %c0_i32_0 = arith.constant 0 : i32
    return %1, %arg1, %c0_i32 : i32, i32, i32
  }
  func.func @transform_2(%arg0: i32, %arg1: i32, %arg2: memref<2xi32, #tpu.memory_space<smem>>) -> (i32, i32, i32) {
    %0 = arith.index_cast %arg0 : i32 to index
    %1 = memref.load %arg2[%0] : memref<2xi32, #tpu.memory_space<smem>>
    %c0_i32 = arith.constant 0 : i32
    %c0_i32_0 = arith.constant 0 : i32
    %c0_i32_1 = arith.constant 0 : i32
    return %1, %c0_i32, %c0_i32_0 : i32, i32, i32
  }
  func.func @transform_3(%arg0: i32, %arg1: i32, %arg2: memref<2xi32, #tpu.memory_space<smem>>) -> (i32, i32) {
    %c0_i32 = arith.constant 0 : i32
    %c0_i32_0 = arith.constant 0 : i32
    return %arg0, %c0_i32 : i32, i32
  }
}

</mosaic_0001>

<bundles_post_ra>
// kernel: tpu_custom_call.1
= control target key start
LH: loop header
LB: loop body
LE: loop exit
PB: predicated region body
PF: predicated region fallthrough
CT: control target
= control target key end

     0   :  { %s1008_s18 = smov [#allocation4]   ;;  %s1299_s0 = inlined_call_operand.hbm [shape: s32[2], index: 0, kind: input, shape index: {}]   ;;  %s1300_s1 = inlined_call_operand.hbm [shape: bf16[128,128], index: 1, kind: input, shape index: {}]   ;;  %s1301_s2 = inlined_call_operand.hbm [shape: bf16[2,128,128], index: 2, kind: input, shape index: {}]   ;;  %s1302_s3 = inlined_call_operand.vmem [shape: f32[2,1,128], index: 3, kind: input, shape index: {}]   ;;  %s1303_s4 = inlined_call_operand.hbm [shape: f32[128,128], index: 4, kind: output, shape index: {}]  }
   0x1   :  { %1310 = sst [smem:[#allocation21_spill]] %s1300_s1  ;;  %s10_s17 = sshll.u32 %s1299_s0, 4  ;;  %s11_s17 = int_to_ptr.hbm [resolvable:$true] %s10_s17 }
   0x2   :  { %13 = dma.hbm_to_smem %s11_s17, 16, %s1008_s18, [#allocation3] }
   0x3   :  { %958 = dma.done.wait [#allocation3], 16 }
   0x4   :  { %959 = vsyncadd [#allocation3], 4294967280 }
   0x5   :  { %16 = sfence }
   0x6   :  { %17 = vsyncpa [#allocation6], 0 }
   0x7   :  { %19 = vsyncpa [#allocation6 + $0x1], 0 }
   0x8   :  { %20 = vsyncpa [#allocation9], 0 }
   0x9   :  { %22 = vsyncpa [#allocation9 + $0x1], 0 }
   0xa   :  { %23 = vsyncpa [#allocation7], 0 }
   0xb   :  { %25 = vsyncpa [#allocation7 + $0x1], 0  ;;  %s1041_s19 = smov 0   ;;  %s1043_s20 = smov 0  }
   0xc   :  { %s1045_s21 = smov 0   ;;  %s1047_s22 = smov 0  }
   0xd   :  { %s1049_s0 = smov 0   ;;  %s1051_s23 = smov 0  }
   0xe   :  { %s1053_s24 = smov 0   ;;  %s1055_s25 = smov 0  }
   0xf   :  { %s1057_s26 = smov 0  }
  0x10 LB: > { %1311 = sst [smem:[#allocation17_spill]] %s994_s23  ;;  %s615_s27 = sadd.s32 4294967295, %s1006_s26   ;;  %s1006_s26 = sphi %s1057_s26, %s31_s26   ;;  %s1002_s25 = sphi %s1055_s25, %s1333_s25   ;;  %s998_s24 = sphi %s1053_s24, %s1332_s24   ;;  %s994_s23 = sphi %s1051_s23, %s1331_s23   ;;  %s990_s0 = sphi %s1049_s0, %s1338_s0   ;;  %s986_s22 = sphi %s1047_s22, %s1337_s22   ;;  %s982_s21 = sphi %s1045_s21, %s1336_s21   ;;  %s978_s20 = sphi %s1043_s20, %s1335_s20   ;;  %s974_s19 = sphi %s1041_s19, %s1334_s19  }
  0x11   : > { %1312 = sst [smem:[#allocation18_spill]] %s1002_s25  ;;  %s616_s28 = sadd.s32 4294967294, %s1006_s26  }
  0x12   : > { %s43_s29 = sadd.s32 1, %s1002_s25  ;;  %s52_s30 = sadd.s32 1, %s994_s23 }
  0x13   : > { %p45_p0 = scmp.ge.s32.totalorder %s43_s29, 2  ;;  %p59_p1 = scmp.ne.s32.totalorder %s994_s23, %s990_s0 }
  0x14   : > { %p60_p2 = scmp.eq.s32.totalorder %s1006_s26, 0  ;;  %p65_p3 = scmp.ne.s32.totalorder %s990_s0, %s986_s22 }
  0x15   : > { %s1340_s29 = smov (%p45_p0, %s43_s29), 0  ;;  %p1106_p5 = scmp.eq.s32.totalorder %s615_s27, 0 }
  0x16   : > { %1313 = sst [smem:[#allocation19_spill]] %s1340_s29  ;;  %p1102_p4 = por %p60_p2, %p59_p1 }
  0x17   : > { %s47_s7 = ssub.s32 %s1002_s25, %s1340_s29  ;;  %s1113_s8 = sld [smem:[#allocation4 + %s1002_s25]] }
  0x18   : > { %p50_p6 = scmp.eq.s32.totalorder %s47_s7, 0  ;;  %p1120_p7 = por %p1106_p5, %p65_p3 }
  0x19   : > { %s76_s10 = sld [smem:[#allocation4 + %s1340_s29]]  ;;  %p147_p8 = scmp.eq.s32.totalorder %s615_s27, 1 }
  0x1a   : > { %s1126_s11 = scalar_select %p50_p6, %s994_s23, %s52_s30  }
  0x1b   : > { %p1131_p9 = por %p147_p8, %p59_p1  ;;  %p153_p10 = scmp.eq.s32.totalorder %s616_s28, 1 }
  0x1c   : > { %1317 = sst [smem:[#allocation20_spill]] %s1126_s11  ;;  %p1304_p12 = scmp.lt.s32.totalorder %s1006_s26, 2 }
  0x1d   : > { %p1140_p13 = por %p153_p10, %p65_p3  ;;  %s173_s14 = sand.u32 1, %s994_s23  }
  0x1e   : > { %s619_s15 = sshll.u32 %s173_s14, 5  ;;  %s682_s16 = sshll.u32 %s1002_s25, 5 }
  0x1f   : > { %s1320_s1 = sld [smem:[#allocation21_spill]]  ;;  %s177_s30 = scalar_lea.vmem [#allocation5], %s619_s15 }
  0x20   : > { %s186_s28 = sshll.u32 %s177_s30, 4  ;;  %p730_p0 = pnand %p1304_p12, %p1102_p4  ;;  %s187_s28 = int_to_ptr.vmem [resolvable:$true] %s186_s28 }
  0x21   : > { %p625_p1 = scmp.ge.s32.totalorder %s1006_s26, 1  ;;  %s174_s17 = scalar_lea.sflag [#allocation6], %s173_s14 }
  0x22   : > { %s1306_s15 = smov 4   ;;  %p227_p3 = scmp.lt.s32.totalorder %s1006_s26, 3 }
  0x23   : > { %s77_s5 = ssub.s32 %s1113_s8, %s76_s10  ;;  %p89_p8 = scmp.ne.s32.totalorder %s982_s21, %s978_s20 }
  0x24   : > { %p1158_p6 = pnand %p625_p1, %p227_p3  ;;  %p80_p4 = scmp.eq.s32.totalorder %s77_s5, 0 }
  0x25   : > { %s183_s27 = scalar_lea.hbm %s1320_s1, %s682_s16  ;;  %s1305_s16 = smov 64  }
  0x26   : > { %s184_s7 = sshll.u32 %s183_s27, 4  ;;  %s82_s27 = sadd.s32 1, %s982_s21  ;;  %s185_s7 = int_to_ptr.hbm [resolvable:$true] %s184_s7 }
  0x27   : > { %732 = dma.hbm_to_vmem [thread:$0]  (!%p730_p0), %s185_s7, 512, %s187_s28, %s174_s17, %s1305_s16, %s1305_s16, %s1306_s15  }
  0x28   : > { %p95_p10 = scmp.ne.s32.totalorder %s978_s20, %s974_s19  ;;  %s196_s14 = sand.u32 1, %s982_s21  }
  0x29   : > { %s1170_s30 = scalar_select %p80_p4, %s982_s21, %s82_s27  }
  0x2a   : > { %p91_p11 = por %p89_p8, %p60_p2  ;;  %p1176_p12 = por %p95_p10, %p1106_p5 }
  0x2b   : > { %s622_s7 = sshll.u32 %s196_s14, 6  ;;  %p1323_p0 = scmp.lt.s32.totalorder %s1006_s26, 2 }
  0x2c   : > { %s722_s8 = scalar_select %p91_p11, [#allocation4], [#allocation11] }
  0x2d   : > { %p1182_p1 = pnand %p1323_p0, %p91_p11  ;;  %p1325_p3 = pmov %p1323_p0 }
  0x2e   : > { %s723_s10 = scalar_select %p91_p11, %s1002_s25, 0 }
  0x2f   : > { %s1342_s8 = smov (!%p1325_p3, %s722_s8), [#allocation12]  ;;  %p1326_p4 = pmov %p1323_p0 }
  0x30   : > { %s200_s5 = scalar_lea.vmem [#allocation8], %s622_s7  ;;  %s197_s11 = scalar_lea.sflag [#allocation9], %s196_s14 }
  0x31   : > { %s1344_s10 = smov (!%p1326_p4, %s723_s10), 0  ;;  %s211_s6 = sshll.u32 %s200_s5, 4  ;;  %s212_s6 = int_to_ptr.vmem [resolvable:$true] %s211_s6 }
  0x32   : > { %s201_s19 = sld [smem:[%s1342_s8 + %s1344_s10]]  ;;  %p868_p5 = pneg %p1182_p1 }
  0x33   : > { %s871_s10 = scalar_lea.hbm %s1301_s2, 128 }
  0x38   : > { %s683_s27 = sshll.u32 %s201_s19, 6 }
  0x39   : > { %s208_s1 = scalar_lea.hbm %s1301_s2, %s683_s27 }
  0x3a   : > { %s209_s29 = sshll.u32 %s208_s1, 4  ;;  %s210_s29 = int_to_ptr.hbm [resolvable:$true] %s209_s29 }
  0x3b   : > { %s864_s23 = sshra.s32 %s210_s29, 4  ;;  %s865_s23 = int_to_ptr.hbm [resolvable:$true] %s864_s23 }
  0x3c   : > { %s866_s25 = scalar_lea.hbm %s865_s23, 64  ;;  %p872_p10 = scmp.lt.s32.totalorder %s865_s23, %s1301_s2 }
  0x3d   : > { %p867_p2 = scmp.ne.s32.totalorder %s865_s23, %s866_s25  ;;  %p873_p0 = scmp.lt.s32.totalorder %s871_s10, %s866_s25 }
  0x3f   : > { %p869_p11 = pnand %p868_p5, %p867_p2  ;;  %p874_p3 = por %p873_p0, %p872_p10 }
  0x41   : > { %p870_p8 = pneg %p869_p11 }
  0x43   : > { %p875_p4 = pnand %p874_p3, %p870_p8 }
  0x45   : > { %878 = shalt.err (!%p875_p4)
}
  0x46   : > { %s1327_s1 = smov 4   ;;  %s1328_s16 = smov 64  }
  0x47   : > { %737 = dma.hbm_to_vmem [thread:$0]  (!%p1182_p1), %s210_s29, 1024, %s212_s6, %s197_s11, %s1328_s16, %s1328_s16, %s1327_s1  }
  0x48   : > { %231 = sbr.rel (%p1158_p6) target bundleno = 262 (0x106), region = 32  ;;  %s1210_s15 = sand.u32 (!%p1158_p6), 1, %s990_s0  }
  0x49   : > { %s626_s23 = sshll.u32 (!%p1158_p6), %s1210_s15, 5  ;;  %s234_s25 = scalar_lea.sflag (!%p1158_p6), [#allocation6], %s1210_s15 }
  0x4a   : > { %s1214_s14 = scalar_lea.vmem (!%p1158_p6), [#allocation5], %s626_s23 }
  0x4d   : > { %961 = dma.done.wait (%p1120_p7), %s234_s25, 512  }
  0x4e   : > { %963 = vsyncadd (%p1120_p7), %s234_s25, 4294966784  ;;  %s243_s29 = sand.u32 1, %s978_s20  }
  0x4f   : > { %s627_s11 = sshll.u32 %s243_s29, 6  ;;  %s244_s18 = scalar_lea.sflag [#allocation9], %s243_s29 }
  0x50   : > { %s1221_s17 = scalar_lea.vmem [#allocation8], %s627_s11 }
  0x51   : > { %965 = dma.done.wait (%p1176_p12), %s244_s18, 1024  }
  0x52   : > { %967 = vsyncadd (%p1176_p12), %s244_s18, 4294966272  ;;  %s283_s6 = sld [smem:[#allocation4 + %s998_s24]]  ;;  %v695_v0 = vld [vmem:[%s1221_s17 + $0x38] sm:$0xff]  ;;  %v694_v1 = vld [vmem:[%s1221_s17 + $0x30] sm:$0xff]  ;;  %s628_s8 = sshll.u32 %s1210_s15, 6 }
  0x53   : > { %405 = vmatpush.bf16.msra.mxu0 %v695_v0  ;;  %697 = vmatpush.bf16.msra.mxu1 %v695_v0  ;;  %v693_v2 = vld [vmem:[%s1221_s17 + $0x28] sm:$0xff]  ;;  %v692_v3 = vld [vmem:[%s1221_s17 + $0x20] sm:$0xff]  ;;  %v691_v4 = vld [vmem:[%s1221_s17 + $0x18] sm:$0xff]  ;;  %s279_s19 = scalar_lea.vmem [#allocation10], %s628_s8  ;;  %s696_s5 = sshll.u32 %s998_s24, 6 }
  0x54   : > { %698 = vmatpush.bf16.msra.mxu2 %v695_v0  ;;  %699 = vmatpush.bf16.msra.mxu3 %v695_v0  ;;  %v690_v5 = vld [vmem:[%s1221_s17 + $0x10] sm:$0xff]  ;;  %v689_v6 = vld [vmem:[%s1221_s17 + $0x8] sm:$0xff]  ;;  %v688_v7 = vld [vmem:[%s1221_s17] sm:$0xff]  ;;  %s493_s23 = scalar_lea.hbm %s1303_s4, %s696_s5  ;;  %s494_s25 = sshll.u32 %s279_s19, 4  ;;  %s495_s25 = int_to_ptr.vmem [resolvable:$true] %s494_s25 }
  0x55   : > { %v684_v8 = vld [vmem:[%s1214_s14] sm:$0xff]  ;;  %v685_v9 = vld [vmem:[%s1214_s14 + $0x8] sm:$0xff]  ;;  %v686_v10 = vld [vmem:[%s1214_s14 + $0x10] sm:$0xff]  ;;  %s482_s24 = scalar_lea.sflag [#allocation7], %s1210_s15 }
  0x56   : > { %v687_v11 = vld [vmem:[%s1214_s14 + $0x18] sm:$0xff]  ;;  %s496_s14 = sshll.u32 %s493_s23, 4  ;;  %s497_s14 = int_to_ptr.hbm [resolvable:$true] %s496_s14 }
  0x57   : > { %406 = vmatpush.bf16.msra.mxu0 %v694_v1  ;;  %700 = vmatpush.bf16.msra.mxu1 %v694_v1  ;;  %s908_s29 = sshra.s32 %s497_s14, 4  ;;  %s909_s29 = int_to_ptr.hbm [resolvable:$true] %s908_s29 }
  0x58   : > { %p284_p7 = scmp.lt.s32.totalorder %s283_s6, 1  ;;  %701 = vmatpush.bf16.msra.mxu2 %v694_v1  ;;  %702 = vmatpush.bf16.msra.mxu3 %v694_v1  ;;  %s910_s11 = scalar_lea.hbm %s909_s29, 64 }
  0x59   : > { %p911_p12 = scmp.ne.s32.totalorder %s909_s29, %s910_s11  ;;  %p915_p2 = scmp.lt.s32.totalorder %s909_s29, %s1303_s4 }
  0x5a   : > { %s1346_s6 = smov (!%p284_p7, %s283_s6), 1 }
  0x5b   : > { %s286_s27 = scalar_lea.vmem %s1302_s3, %s1346_s6  ;;  %407 = vmatpush.bf16.msra.mxu0 %v693_v2  ;;  %703 = vmatpush.bf16.msra.mxu1 %v693_v2  ;;  %p912_p6 = pnand %p911_p12, %p1131_p9 }
  0x5c   : > { %704 = vmatpush.bf16.msra.mxu2 %v693_v2  ;;  %705 = vmatpush.bf16.msra.mxu3 %v693_v2  ;;  %v821_v12 = vld [vmem:[%s286_s27] ss:$0 sm:$0xff]  ;;  %s914_s6 = scalar_lea.hbm %s1303_s4, 128 }
  0x5d   : > { %p913_p1 = pneg %p912_p6  ;;  %p916_p5 = scmp.lt.s32.totalorder %s914_s6, %s910_s11 }
  0x5f   : > { %408 = vmatpush.bf16.msra.mxu0 %v692_v3  ;;  %706 = vmatpush.bf16.msra.mxu1 %v692_v3  ;;  %p917_p11 = por %p916_p5, %p915_p2 }
  0x60   : > { %707 = vmatpush.bf16.msra.mxu2 %v692_v3  ;;  %708 = vmatpush.bf16.msra.mxu3 %v692_v3 }
  0x61   : > { %p918_p8 = pnand %p917_p11, %p913_p1 }
  0x63   : > { %409 = vmatpush.bf16.msra.mxu0 %v691_v4  ;;  %709 = vmatpush.bf16.msra.mxu1 %v691_v4 }
  0x64   : > { %710 = vmatpush.bf16.msra.mxu2 %v691_v4  ;;  %711 = vmatpush.bf16.msra.mxu3 %v691_v4 }
  0x67   : > { %410 = vmatpush.bf16.msra.mxu0 %v690_v5  ;;  %712 = vmatpush.bf16.msra.mxu1 %v690_v5 }
  0x68   : > { %713 = vmatpush.bf16.msra.mxu2 %v690_v5  ;;  %714 = vmatpush.bf16.msra.mxu3 %v690_v5 }
  0x6b   : > { %411 = vmatpush.bf16.msra.mxu0 %v689_v6  ;;  %715 = vmatpush.bf16.msra.mxu1 %v689_v6 }
  0x6c   : > { %716 = vmatpush.bf16.msra.mxu2 %v689_v6  ;;  %717 = vmatpush.bf16.msra.mxu3 %v689_v6 }
  0x6f   : > { %412 = vmatpush.bf16.msra.mxu0 %v688_v7  ;;  %718 = vmatpush.bf16.msra.mxu1 %v688_v7 }
  0x70   : > { %719 = vmatpush.bf16.msra.mxu2 %v688_v7  ;;  %720 = vmatpush.bf16.msra.mxu3 %v688_v7 }
  0x72   : > { %413 = vmatmul.bf16.vlgmr.msra.gmra.mxu0 %v684_v8  ;;  %418 = vmatmul.bf16.vlgmr.msra.gmra.mxu1 %v685_v9 }
  0x73   : > { %423 = vmatmul.bf16.vlgmr.msra.gmra.mxu2 %v686_v10  ;;  %428 = vmatmul.bf16.vlgmr.msra.gmra.mxu3 %v687_v11 }
  0xef   : > { %v414_v13 = vpop.f32.mrf.mxu0  ;;  %v419_v14 = vpop.f32.mrf.mxu1 }
  0xf0   : > { %v465_v15 = vadd.f32 %v821_v12, %v414_v13  ;;  %v467_v16 = vadd.f32 %v821_v12, %v419_v14 }
  0xf2   : > { %473 = vst [vmem:[%s279_s19] sm:$0xff] %v465_v15 }
  0xf3   : > { %475 = vst [vmem:[%s279_s19 + $0x10] sm:$0xff] %v467_v16 }
  0xf6   : > { %v424_v17 = vpop.f32.mrf.mxu2  ;;  %v429_v18 = vpop.f32.mrf.mxu3 }
  0xf7   : > { %v469_v19 = vadd.f32 %v821_v12, %v424_v17  ;;  %v471_v20 = vadd.f32 %v821_v12, %v429_v18  ;;  %v416_v21 = vpop.f32.mrf.mxu0  ;;  %v421_v22 = vpop.f32.mrf.mxu1 }
  0xf8   : > { %v466_v23 = vadd.f32 %v821_v12, %v416_v21  ;;  %v468_v24 = vadd.f32 %v821_v12, %v421_v22 }
  0xf9   : > { %477 = vst [vmem:[%s279_s19 + $0x20] sm:$0xff] %v469_v19 }
  0xfa   : > { %479 = vst [vmem:[%s279_s19 + $0x30] sm:$0xff] %v471_v20 }
  0xfb   : > { %474 = vst [vmem:[%s279_s19 + $0x8] sm:$0xff] %v466_v23 }
  0xfc   : > { %476 = vst [vmem:[%s279_s19 + $0x18] sm:$0xff] %v468_v24 }
  0xfe   : > { %v426_v25 = vpop.f32.mrf.mxu2  ;;  %v431_v26 = vpop.f32.mrf.mxu3 }
  0xff   : > { %v470_v27 = vadd.f32 %v821_v12, %v426_v25  ;;  %v472_v28 = vadd.f32 %v821_v12, %v431_v26 }
 0x101   : > { %478 = vst [vmem:[%s279_s19 + $0x28] sm:$0xff] %v470_v27 }
 0x102   : > { %480 = vst [vmem:[%s279_s19 + $0x38] sm:$0xff] %v472_v28 }
 0x103   : > { %921 = shalt.err (!%p918_p8)
}
 0x104   : > { %s1011_s15 = smov 128   ;;  %s1012_s27 = smov 8  }
 0x105   : > { %727 = dma.vmem_to_hbm [thread:$0]  (%p1131_p9), %s495_s25, 1024, %s497_s14, %s482_s24, %s1011_s15, %s1011_s15, %s1012_s27  }
 0x106 PF: > { %s511_s8 = sand.u32 1, %s986_s22   ;;  %p1329_p10 = scmp.ge.s32.totalorder %s1006_s26, 2 }
 0x107   : > { %s512_s7 = scalar_lea.sflag [#allocation7], %s511_s8 }
 0x108   : > { %p739_p0 = pnand %p1329_p10, %p1140_p13 }
 0x10a   : > { %p740_p3 = pneg %p739_p0 }
 0x10c   : > { %969 = dma.done.wait (%p740_p3), %s512_s7, 1024  }
 0x10d   : > { %971 = vsyncadd (%p740_p3), %s512_s7, 4294966272  ;;  %s31_s26 = sadd.s32 1, %s1006_s26   ;;  %s1330_s12 = sld [smem:[#allocation17_spill]] }
 0x10e   : > { %p28_p4 = scmp.ge.s32.totalorder %s31_s26, 4   ;;  %s1331_s23 = sld [smem:[#allocation20_spill]] }
 0x10f   : > { %s1332_s24 = sld [smem:[#allocation18_spill]]  ;;  %s1334_s19 = smov %s978_s20 }
 0x110   : > { %s1333_s25 = sld [smem:[#allocation19_spill]]  ;;  %s1335_s20 = smov %s982_s21 }
 0x111   : > { %s1336_s21 = smov %s1170_s30  ;;  %s1337_s22 = smov %s990_s0 }
 0x112   :  { %30 = sbr.rel (!%p28_p4) target bundleno = 16 (0x10), region = 101 }
 0x113   : > { %s1338_s0 = smov %s1330_s12 }
 0x117   :  { %518 = vsyncpa [#allocation6], 1 }
 0x118   :  { %520 = vsyncpa [#allocation6 + $0x1], 1 }
 0x119   :  { %521 = vsyncpa [#allocation9], 1 }
 0x11a   :  { %523 = vsyncpa [#allocation9 + $0x1], 1 }
 0x11b   :  { %524 = vsyncpa [#allocation7], 1 }
 0x11c   :  { %526 = vsyncpa [#allocation7 + $0x1], 1 }

</bundles_post_ra>
